<compile_context>
chip_gen: v7x
topology: tpu7x:2x2x1
jax: 0.10.0
libtpu: 0.0.40
codegen_flags: <defaults>
</compile_context>

<pallas_src>
import functools

import jax
import jax.numpy as jnp
from jax import lax
from jax.experimental import pallas as pl
from jax.experimental.pallas import tpu as pltpu


def _round_up(n: int, m: int) -> int:
    return ((n + m - 1) // m) * m


def _pick_row_tile(n_pad: int) -> int:
    for c in (256, 128, 64, 32, 16, 8):
        if n_pad % c == 0:
            return c
    return n_pad  # unreachable: n_pad is a multiple of 8


def _lm_head_kernel(x_ref, g_ref, bln_ref, w_ref, b_ref, o_ref, *, eps):
    """One (tm, tn) logits tile: LayerNorm(x_rows) @ W[:, vocab_tile] + b.

    x_ref   : (tm, D)  hidden-state rows for this row tile
    g_ref   : (1, D)   LayerNorm weight
    bln_ref : (1, D)   LayerNorm bias
    w_ref   : (D, tn)  lm_head weight slice (pre-transposed, bf16)
    b_ref   : (1, tn)  lm_head bias slice (f32)
    o_ref   : (tm, tn) float32 logits tile
    """
    # LayerNorm in f32 (recomputed per vocab tile; negligible vs the matmul).
    x = x_ref[...].astype(jnp.float32)
    mean = jnp.mean(x, axis=-1, keepdims=True)
    xc = x - mean
    var = jnp.mean(xc * xc, axis=-1, keepdims=True)
    xn = xc * lax.rsqrt(var + eps)
    xn = xn * g_ref[...].astype(jnp.float32) + bln_ref[...].astype(jnp.float32)

    # bf16 x bf16 -> f32 accumulation on the MXU.
    acc = jnp.dot(xn.astype(w_ref.dtype), w_ref[...],
                  preferred_element_type=jnp.float32)
    o_ref[...] = acc + b_ref[...].astype(jnp.float32)


def prepare_lm_head_params(ln_weight, ln_bias, lm_weight, lm_bias, *, tn=None):
    """One-time (init) parameter prep.

    lm_weight is the torch nn.Linear layout (V, D). Returns the transposed,
    bf16-cast, vocab-padded weight plus reshaped LN/bias params and the chosen
    vocab tile width tn. Doing this once at init avoids re-materializing a
    full D x V padded copy in HBM on every forward call.
    """
    V, D = lm_weight.shape
    v128 = _round_up(V, 128)
    if tn is None:
        tn = 512 if v128 >= 512 else v128      # tn >= 512 whenever vocab allows
    V_pad = _round_up(V, tn)

    w_t = jnp.asarray(lm_weight).T.astype(jnp.bfloat16)   # (D, V) bf16
    b = jnp.asarray(lm_bias).astype(jnp.float32)
    if V_pad != V:
        w_t = jnp.pad(w_t, ((0, 0), (0, V_pad - V)))
        b = jnp.pad(b, ((0, V_pad - V),))

    g2 = jnp.asarray(ln_weight).reshape(1, D)
    bln2 = jnp.asarray(ln_bias).reshape(1, D)
    return g2, bln2, w_t, b.reshape(1, V_pad), tn


def codegen_flash_lm_head(
    hidden_states: jax.Array,     # (..., D)
    ln_weight2d: jax.Array,       # (1, D)
    ln_bias2d: jax.Array,         # (1, D)
    lm_weight_t_pad: jax.Array,   # (D, V_pad) bf16, pre-padded/transposed
    lm_bias2d_pad: jax.Array,     # (1, V_pad) f32
    *,
    vocab_size: int,
    tn: int,
    eps: float = 1e-5,
) -> jax.Array:
    """Pallas implementation of CodeGenFlashLMHead.forward."""
    lead_shape = hidden_states.shape[:-1]
    D = hidden_states.shape[-1]
    V_pad = lm_weight_t_pad.shape[1]
    assert V_pad % tn == 0 and tn % 128 == 0

    x = hidden_states.reshape(-1, D)
    N = x.shape[0]
    N_pad = _round_up(max(N, 8), 8)           # pad rows to 8 only (no 128 blow-up)
    if N_pad != N:
        x = jnp.pad(x, ((0, N_pad - N), (0, 0)))
    tm = _pick_row_tile(N_pad)

    # Vocab axis OUTER, rows INNER: weight tile index depends only on the
    # outer axis -> each (D, tn) weight tile is fetched from HBM exactly once.
    grid = (V_pad // tn, N_pad // tm)
    n_vtiles = grid[0]

    w_bytes = lm_weight_t_pad.dtype.itemsize
    x_bytes = x.dtype.itemsize
    cost = pl.CostEstimate(
        flops=2 * N_pad * V_pad * D,
        transcendentals=0,
        bytes_accessed=(D * V_pad * w_bytes            # weights, read once
                        + N_pad * D * x_bytes * n_vtiles  # activations restreamed
                        + V_pad * 4
                        + N_pad * V_pad * 4),          # f32 logits writeback
    )

    # Double-buffered tile footprint + small resident params; cap for v7x's
    # 64 MiB physical VMEM while staying above the default scoped limit.
    vmem_bytes = 2 * (tm * D * x_bytes + D * tn * w_bytes + tn * 4 + tm * tn * 4)
    vmem_bytes += 4 * D * 4
    vmem_limit = int(min(max(2 * vmem_bytes, 32 * 2**20), 64 * 2**20))

    out = pl.pallas_call(
        functools.partial(_lm_head_kernel, eps=eps),
        out_shape=jax.ShapeDtypeStruct((N_pad, V_pad), jnp.float32),
        grid_spec=pltpu.PrefetchScalarGridSpec(
            num_scalar_prefetch=0,
            grid=grid,
            in_specs=[
                pl.BlockSpec((tm, D), lambda j, i: (i, 0)),   # hidden rows
                pl.BlockSpec((1, D), lambda j, i: (0, 0)),    # ln weight
                pl.BlockSpec((1, D), lambda j, i: (0, 0)),    # ln bias
                pl.BlockSpec((D, tn), lambda j, i: (0, j)),   # lm_head W^T (bf16)
                pl.BlockSpec((1, tn), lambda j, i: (0, j)),   # lm_head bias
            ],
            out_specs=pl.BlockSpec((tm, tn), lambda j, i: (i, j)),
        ),
        compiler_params=pltpu.CompilerParams(
            dimension_semantics=("parallel", "parallel"),
            vmem_limit_bytes=vmem_limit,
        ),
        cost_estimate=cost,
    )(x, ln_weight2d, ln_bias2d, lm_weight_t_pad, lm_bias2d_pad)

    if N_pad != N or V_pad != vocab_size:
        out = out[:N, :vocab_size]
    return out.reshape(*lead_shape, vocab_size)


if __name__ == "__main__":
    # Small config consistent with the module: n_embd=128, vocab_size=1024
    # (already a multiple of pad_vocab_size_multiple), eps=1e-5, batch=2, seq=8.
    B, S, D, V = 2, 8, 128, 1024
    EPS = 1e-5

    key = jax.random.PRNGKey(0)
    k_x, k_g, k_b, k_w, k_lb = jax.random.split(key, 5)

    hidden_states = jax.random.normal(k_x, (B, S, D), dtype=jnp.float32)
    ln_weight = 1.0 + 0.1 * jax.random.normal(k_g, (D,), dtype=jnp.float32)
    ln_bias = 0.1 * jax.random.normal(k_b, (D,), dtype=jnp.float32)
    # torch nn.Linear weight layout: (vocab, n_embd)
    lm_weight = jax.random.normal(k_w, (V, D), dtype=jnp.float32) / jnp.sqrt(D)
    lm_bias = 0.1 * jax.random.normal(k_lb, (V,), dtype=jnp.float32)

    # One-time param prep (transpose, bf16 cast, vocab padding).
    g2, bln2, w_t_pad, b2_pad, tn = prepare_lm_head_params(
        ln_weight, ln_bias, lm_weight, lm_bias
    )

    logits = codegen_flash_lm_head(
        hidden_states, g2, bln2, w_t_pad, b2_pad,
        vocab_size=V, tn=tn, eps=EPS,
    )
    logits = jax.block_until_ready(logits)

    # Plain-JAX reference (full f32): LayerNorm -> Linear -> float32.
    xf = hidden_states.astype(jnp.float32)
    mean = xf.mean(-1, keepdims=True)
    var = ((xf - mean) ** 2).mean(-1, keepdims=True)
    xn = (xf - mean) * lax.rsqrt(var + EPS) * ln_weight + ln_bias
    ref = (xn @ lm_weight.T + lm_bias).astype(jnp.float32)

    assert logits.shape == (B, S, V)
    assert logits.dtype == jnp.float32
    # Matmul operands are bf16 (f32 accumulation), so allow bf16-level error.
    assert jnp.allclose(logits, ref, atol=3e-2, rtol=3e-2), (
        "mismatch vs reference LM head"
    )

    print("KERNEL_OK")
</pallas_src>

<mosaic_0001>
module attributes {stable_mosaic.version = 11 : i64} {
  func.func @_lm_head_kernel(%arg0: i32, %arg1: i32, %arg2: memref<16x128xf32, #tpu.memory_space<vmem>>, %arg3: memref<1x128xf32, #tpu.memory_space<vmem>>, %arg4: memref<1x128xf32, #tpu.memory_space<vmem>>, %arg5: memref<128x512xbf16, #tpu.memory_space<vmem>>, %arg6: memref<1x512xf32, #tpu.memory_space<vmem>>, %arg7: memref<16x512xf32, #tpu.memory_space<vmem>>) attributes {dimension_semantics = [#tpu.dimension_semantics<parallel>, #tpu.dimension_semantics<parallel>], iteration_bounds = array<i64: 2, 1>, scalar_prefetch = 0 : i64, scratch_operands = 0 : i64, tpu.core_type = #tpu.core_type<tc>, window_params = [{transform_indices = @transform_0, window_bounds = array<i64: 16, 128>}, {pipeline_mode = #tpu.pipeline_mode<synchronous>, transform_indices = @transform_1, window_bounds = array<i64: 1, 128>}, {pipeline_mode = #tpu.pipeline_mode<synchronous>, transform_indices = @transform_2, window_bounds = array<i64: 1, 128>}, {transform_indices = @transform_3, window_bounds = array<i64: 128, 512>}, {transform_indices = @transform_4, window_bounds = array<i64: 1, 512>}, {transform_indices = @transform_5, window_bounds = array<i64: 16, 512>}]} {
    %c0 = arith.constant 0 : index
    %c0_0 = arith.constant 0 : index
    %0 = vector.load %arg2[%c0, %c0_0] : memref<16x128xf32, #tpu.memory_space<vmem>>, vector<16x128xf32>
    %cst = arith.constant dense<0.000000e+00> : vector<16xf32>
    %1 = vector.multi_reduction <add>, %0, %cst [1] : vector<16x128xf32> to vector<16xf32>
    %2 = vector.shape_cast %1 : vector<16xf32> to vector<16x1xf32>
    %cst_1 = arith.constant 1.280000e+02 : f32
    %3 = vector.broadcast %cst_1 : f32 to vector<16x1xf32>
    %4 = arith.divf %2, %3 : vector<16x1xf32>
    %5 = vector.broadcast %4 : vector<16x1xf32> to vector<16x128xf32>
    %6 = arith.subf %0, %5 : vector<16x128xf32>
    %7 = arith.mulf %6, %6 : vector<16x128xf32>
    %cst_2 = arith.constant dense<0.000000e+00> : vector<16xf32>
    %8 = vector.multi_reduction <add>, %7, %cst_2 [1] : vector<16x128xf32> to vector<16xf32>
    %9 = vector.shape_cast %8 : vector<16xf32> to vector<16x1xf32>
    %cst_3 = arith.constant 1.280000e+02 : f32
    %10 = vector.broadcast %cst_3 : f32 to vector<16x1xf32>
    %11 = arith.divf %9, %10 : vector<16x1xf32>
    %cst_4 = arith.constant 9.99999974E-6 : f32
    %12 = vector.broadcast %cst_4 : f32 to vector<16x1xf32>
    %13 = arith.addf %11, %12 : vector<16x1xf32>
    %14 = math.rsqrt %13 : vector<16x1xf32>
    %15 = vector.broadcast %14 : vector<16x1xf32> to vector<16x128xf32>
    %16 = arith.mulf %6, %15 : vector<16x128xf32>
    %c0_5 = arith.constant 0 : index
    %c0_6 = arith.constant 0 : index
    %17 = vector.load %arg3[%c0_5, %c0_6] : memref<1x128xf32, #tpu.memory_space<vmem>>, vector<1x128xf32>
    %18 = vector.broadcast %17 : vector<1x128xf32> to vector<16x128xf32>
    %19 = arith.mulf %16, %18 : vector<16x128xf32>
    %c0_7 = arith.constant 0 : index
    %c0_8 = arith.constant 0 : index
    %20 = vector.load %arg4[%c0_7, %c0_8] : memref<1x128xf32, #tpu.memory_space<vmem>>, vector<1x128xf32>
    %21 = vector.broadcast %20 : vector<1x128xf32> to vector<16x128xf32>
    %22 = arith.addf %19, %21 : vector<16x128xf32>
    %23 = arith.truncf %22 : vector<16x128xf32> to vector<16x128xbf16>
    %c0_9 = arith.constant 0 : index
    %c0_10 = arith.constant 0 : index
    %24 = vector.load %arg5[%c0_9, %c0_10] : memref<128x512xbf16, #tpu.memory_space<vmem>>, vector<128x512xbf16>
    %cst_11 = arith.constant dense<0.000000e+00> : vector<16x512xf32>
    %25 = tpu.matmul %23, %24, %cst_11 {dimension_numbers = #tpu.dot_dimension_numbers<[1], [0], [0], [1], [0, 0, 1, 1], [], []>} : vector<16x128xbf16>, vector<128x512xbf16>, vector<16x512xf32> -> vector<16x512xf32>
    %c0_12 = arith.constant 0 : index
    %c0_13 = arith.constant 0 : index
    %26 = vector.load %arg6[%c0_12, %c0_13] : memref<1x512xf32, #tpu.memory_space<vmem>>, vector<1x512xf32>
    %27 = vector.broadcast %26 : vector<1x512xf32> to vector<16x512xf32>
    %28 = arith.addf %25, %27 : vector<16x512xf32>
    %c0_14 = arith.constant 0 : index
    %c0_15 = arith.constant 0 : index
    %29 = vector.load %arg7[%c0_14, %c0_15] : memref<16x512xf32, #tpu.memory_space<vmem>>, vector<16x512xf32>
    tpu.vector_store %arg7[%c0_14, %c0_15], %28 {strides = array<i32>} : memref<16x512xf32, #tpu.memory_space<vmem>>, vector<16x512xf32>,
    return
  }
  func.func @transform_0(%arg0: i32, %arg1: i32) -> (i32, i32) {
    %c0_i32 = arith.constant 0 : i32
    %c0_i32_0 = arith.constant 0 : i32
    return %arg1, %c0_i32 : i32, i32
  }
  func.func @transform_1(%arg0: i32, %arg1: i32) -> (i32, i32) {
    %c0_i32 = arith.constant 0 : i32
    %c0_i32_0 = arith.constant 0 : i32
    %c0_i32_1 = arith.constant 0 : i32
    return %c0_i32, %c0_i32_0 : i32, i32
  }
  func.func @transform_2(%arg0: i32, %arg1: i32) -> (i32, i32) {
    %c0_i32 = arith.constant 0 : i32
    %c0_i32_0 = arith.constant 0 : i32
    %c0_i32_1 = arith.constant 0 : i32
    return %c0_i32, %c0_i32_0 : i32, i32
  }
  func.func @transform_3(%arg0: i32, %arg1: i32) -> (i32, i32) {
    %c0_i32 = arith.constant 0 : i32
    %c0_i32_0 = arith.constant 0 : i32
    return %c0_i32, %arg0 : i32, i32
  }
  func.func @transform_4(%arg0: i32, %arg1: i32) -> (i32, i32) {
    %c0_i32 = arith.constant 0 : i32
    %c0_i32_0 = arith.constant 0 : i32
    return %c0_i32, %arg0 : i32, i32
  }
  func.func @transform_5(%arg0: i32, %arg1: i32) -> (i32, i32) {
    %c0_i32 = arith.constant 0 : i32
    return %arg1, %arg0 : i32, i32
  }
}

</mosaic_0001>

<bundles_post_ra>
// kernel: tpu_custom_call.1
= control target key start
LH: loop header
LB: loop body
LE: loop exit
PB: predicated region body
PF: predicated region fallthrough
CT: control target
= control target key end

     0   :  { %10 = vsyncpa [#allocation3], 0  ;;  %s1431_s0 = inlined_call_operand.hbm [shape: f32[16,128], index: 0, kind: input, shape index: {}]   ;;  %s1432_s1 = inlined_call_operand.vmem [shape: f32[1,128], index: 1, kind: input, shape index: {}]   ;;  %s1433_s2 = inlined_call_operand.vmem [shape: f32[1,128], index: 2, kind: input, shape index: {}]   ;;  %s1434_s3 = inlined_call_operand.hbm [shape: bf16[128,1024], index: 3, kind: input, shape index: {}]   ;;  %s1435_s4 = inlined_call_operand.vmem [shape: f32[1,1024], index: 4, kind: input, shape index: {}]   ;;  %s1436_s5 = inlined_call_operand.hbm [shape: f32[16,1024], index: 5, kind: output, shape index: {}]  }
   0x1   :  { %11 = vsyncpa [#allocation6], 0 }
   0x2   :  { %13 = vsyncpa [#allocation6 + $0x1], 0 }
   0x3   :  { %14 = vsyncpa [#allocation4], 0 }
   0x4   :  { %16 = vsyncpa [#allocation4 + $0x1], 0  ;;  %s1156_s18 = smov 0   ;;  %s1158_s19 = smov 0  }
   0x5   :  { %s1160_s20 = smov 0   ;;  %s1162_s21 = smov 0  }
   0x6   :  { %s1164_s22 = smov 0   ;;  %s1166_s23 = smov 0  }
   0x7 LB: > { %1445 = sst [smem:[#allocation11_spill]] %s1112_s23  ;;  %s780_s24 = sadd.s32 4294967295, %s1112_s23   ;;  %s1112_s23 = sphi %s1166_s23, %s22_s23   ;;  %s1108_s22 = sphi %s1164_s22, %s1466_s22   ;;  %s1104_s21 = sphi %s1162_s21, %s1465_s21   ;;  %s1100_s20 = sphi %s1160_s20, %s1464_s20   ;;  %s1096_s19 = sphi %s1158_s19, %s1463_s19   ;;  %s1092_s18 = sphi %s1156_s18, %s1462_s18  }
   0x8   : > { %s781_s25 = sadd.s32 4294967294, %s1112_s23   ;;  %p116_p0 = scmp.ne.s32.totalorder %s1100_s20, %s1096_s19 }
   0x9   : > { %p117_p1 = scmp.eq.s32.totalorder %s1112_s23, 0  ;;  %p122_p2 = scmp.ne.s32.totalorder %s1096_s19, %s1092_s18 }
   0xa   : > { %p1193_p3 = scmp.eq.s32.totalorder %s780_s24, 0  ;;  %p174_p5 = scmp.eq.s32.totalorder %s780_s24, 1 }
   0xb   : > { %p1197_p4 = por %p117_p1, %p116_p0  ;;  %p180_p7 = scmp.eq.s32.totalorder %s781_s25, 1 }
   0xc   : > { %s1446_s26 = scalar_select %p1193_p3, 1, 0 }
   0xd   : > { %p1203_p6 = por %p1193_p3, %p122_p2  ;;  %p1207_p8 = por %p174_p5, %p116_p0 }
   0xe   : > { %p782_p9 = scmp.ge.s32.totalorder %s1112_s23, 1  ;;  %p1212_p10 = por %p180_p7, %p122_p2 }
   0xf   : > { %s1448_s28 = scalar_select %p1203_p6, 1, 0 }
  0x10   : > { %s1449_s29 = scalar_select %p1207_p8, 1, 0 }
  0x11   : > { %s1450_s30 = scalar_select %p1212_p10, 1, 0 }
  0x12   : > { %p187_p11 = scmp.lt.s32.totalorder %s1112_s23, 3  ;;  %s1114_s7 = smov [#allocation2]  }
  0x13   : > { %s202_s8 = sshll.u32 %s1114_s7, 4  ;;  %p855_p1 = scmp.lt.s32.totalorder %s1112_s23, 2  ;;  %s1221_s8 = int_to_ptr.vmem [resolvable:$true] %s202_s8 }
  0x14   : > { %p1217_p12 = pnand %p782_p9, %p187_p11  ;;  %s34_s11 = sadd.s32 1, %s1108_s22 }
  0x15   : > { %p1235_p2 = pnand %p855_p1, %p1197_p4  ;;  %s968_s14 = scalar_lea.hbm %s1431_s0, 256 }
  0x16   : > { %s1451_s6 = scalar_select %p1217_p12, 1, 0 }
  0x17   : > { %p842_p13 = pneg %p1217_p12  ;;  %p969_p7 = scmp.ne.s32.totalorder %s1431_s0, %s968_s14 }
  0x18   : > { %s1453_s10 = scalar_select %p1235_p2, 1, 0 }
  0x19   : > { %p1229_p5 = pnand %p842_p13, %p1193_p3  ;;  %p975_p4 = scmp.lt.u32.totalorder %s968_s14, %s1431_s0 }
  0x1b   : > { %p970_p9 = pneg %p1229_p5 }
  0x1d   : > { %p971_p11 = pnand %p970_p9, %p969_p7 }
  0x1f   : > { %p972_p13 = pneg %p971_p11 }
  0x21   : > { %p977_p1 = pnand %p975_p4, %p972_p13 }
  0x23   : > { %980 = shalt.err (!%p977_p1)
}
  0x24   : > { %s981_s25 = scalar_lea.vmem %s1221_s8, 256  ;;  %p989_p6 = scmp.lt.s32.totalorder %s1221_s8, %s1221_s8 }
  0x25   : > { %p982_p0 = scmp.ne.s32.totalorder %s1221_s8, %s981_s25  ;;  %p990_p3 = scmp.lt.s32.totalorder %s981_s25, %s981_s25 }
  0x27   : > { %p984_p10 = pnand %p982_p0, %p970_p9  ;;  %p991_p12 = por %p990_p3, %p989_p6 }
  0x29   : > { %p985_p8 = pneg %p984_p10 }
  0x2b   : > { %p992_p2 = pnand %p991_p12, %p985_p8 }
  0x2d   : > { %995 = shalt.err (!%p992_p2)
}
  0x2e   : > { %s1115_s27 = smov 128   ;;  %s1116_s7 = smov 8  }
  0x2f   : > { %845 = dma.hbm_to_vmem [thread:$0]  (!%p1229_p5), %s1431_s0, 256, %s1221_s8, [#allocation3], %s1115_s27, %s1115_s27, %s1116_s7  }
  0x30   : > { %p36_p10 = scmp.ge.s32.totalorder %s34_s11, 2  ;;  %s109_s14 = sadd.s32 1, %s1100_s20 }
  0x31   : > { %s222_s15 = sand.u32 1, %s1100_s20   ;;  %s832_s24 = sshll.u32 %s1108_s22, 8 }
  0x32   : > { %s1468_s11 = smov (%p36_p10, %s34_s11), 0  ;;  %s785_s16 = sshll.u32 %s222_s15, 8 }
  0x33   : > { %s106_s17 = ssub.s32 %s1108_s22, %s1468_s11  ;;  %s1271_s9 = scalar_lea.hbm %s1434_s3, %s832_s24 }
  0x34   : > { %p107_p3 = scmp.eq.s32.totalorder %s106_s17, 0  ;;  %s226_s8 = scalar_lea.vmem [#allocation5], %s785_s16 }
  0x35   : > { %s233_s27 = sshll.u32 %s226_s8, 4  ;;  %s1278_s12 = scalar_lea.sflag [#allocation6], %s222_s15  ;;  %s1276_s27 = int_to_ptr.vmem [resolvable:$true] %s233_s27 }
  0x36   : > { %s1274_s7 = scalar_select %p107_p3, %s1100_s20, %s109_s14  }
  0x37   : > { %s996_s13 = scalar_lea.hbm %s1271_s9, 4096  ;;  %p1454_p8 = scmp.ne.s32.totalorder %s1453_s10, 0 }
  0x38   : > { %p997_p6 = scmp.ne.s32.totalorder %s1271_s9, %s996_s13  ;;  %s1001_s24 = scalar_lea.hbm %s1434_s3, 8192 }
  0x39   : > { %p998_p12 = pneg %p1454_p8  ;;  %p1002_p2 = scmp.lt.u32.totalorder %s1271_s9, %s1434_s3 }
  0x3a   : > { %p1003_p7 = scmp.lt.u32.totalorder %s1001_s24, %s996_s13  ;;  %p1005_p11 = scmp.lt.u32.totalorder %s996_s13, %s1271_s9 }
  0x3b   : > { %p999_p0 = pnand %p998_p12, %p997_p6 }
  0x3c   : > { %p1004_p9 = por %p1003_p7, %p1002_p2 }
  0x3d   : > { %p1000_p5 = pneg %p999_p0 }
  0x3e   : > { %p1006_p13 = por %p1005_p11, %p1004_p9 }
  0x40   : > { %p1007_p4 = pnand %p1006_p13, %p1000_p5 }
  0x42   : > { %1010 = shalt.err (!%p1007_p4)
}
  0x43   : > { %s1011_s14 = scalar_lea.vmem %s1276_s27, 4096  ;;  %s1117_s15 = smov [#allocation5]  }
  0x44   : > { %p1012_p1 = scmp.ne.s32.totalorder %s1276_s27, %s1011_s14  ;;  %s1016_s8 = sshll.u32 %s1117_s15, 4  ;;  %s1017_s8 = int_to_ptr.vmem [resolvable:$false] %s1016_s8 }
  0x45   : > { %s1018_s23 = scalar_lea.vmem %s1017_s8, 8192  ;;  %p1019_p6 = scmp.lt.s32.totalorder %s1276_s27, %s1017_s8 }
  0x46   : > { %p1014_p10 = pnand %p1012_p1, %p998_p12  ;;  %p1020_p0 = scmp.lt.s32.totalorder %s1018_s23, %s1011_s14 }
  0x48   : > { %p1015_p3 = pneg %p1014_p10  ;;  %p1021_p2 = por %p1020_p0, %p1019_p6 }
  0x4a   : > { %p1022_p7 = pnand %p1021_p2, %p1015_p3 }
  0x4c   : > { %1025 = shalt.err (!%p1022_p7)
}
  0x4d   : > { %s1118_s13 = smov 512   ;;  %s1119_s17 = smov 256  }
  0x4e   : > { %s1120_s24 = smov 16   ;;  %p1455_p12 = scmp.ne.s32.totalorder %s1451_s6, 0 }
  0x4f   : > { %849 = dma.hbm_to_vmem [thread:$0]  (!%p1454_p8), %s1271_s9, 4096, %s1276_s27, %s1278_s12, %s1118_s13, %s1119_s17, %s1120_s24  }
  0x50   : > { %253 = sbr.rel (%p1455_p12) target bundleno = 643 (0x283), region = 40  ;;  %p1456_p5 = scmp.ne.s32.totalorder (!%p1455_p12), %s1446_s26, 0 }
  0x57   : > { %1079 = dma.done.wait (%p1456_p5), [#allocation3], 256  }
  0x58   : > { %1081 = vsyncadd (%p1456_p5), [#allocation3], 4294967040  ;;  %s1313_s16 = sand.u32 1, %s1096_s19   ;;  %p1457_p8 = scmp.ne.s32.totalorder %s1448_s28, 0 }
  0x59   : > { %s790_s25 = sshll.u32 %s1313_s16, 8  ;;  %s260_s14 = scalar_lea.sflag [#allocation6], %s1313_s16 }
  0x5a   : > { %s1317_s15 = scalar_lea.vmem [#allocation5], %s790_s25 }
  0x5b   : > { %1083 = dma.done.wait (%p1457_p8), %s260_s14, 4096  }
  0x5c   : > { %1085 = vsyncadd (%p1457_p8), %s260_s14, 4294963200  ;;  %v304_v0 = vld [vmem:[#allocation2] sm:$0xff]  ;;  %v305_v1 = vld [vmem:[#allocation2 + $0x8] sm:$0xff]  ;;  %v1121_v36 = vmov 0   ;;  %s792_s9 = sshll.u32 %s1104_s21, 2  ;;  %v382_v60 = vlaneseq  ;;  %s791_s23 = sshll.u32 %s1313_s16, 6 }
  0x5d   : > { %306 = vadd.xlane.f32.xlu0 %v304_v0  ;;  %v916_v2 = vld [vmem:[%s1317_s15 + $0x4] ss:$16 sps:$4 sm:$0xff]   ;;  %v918_v3 = vld [vmem:[%s1317_s15 + $0xc] ss:$16 sps:$4 sm:$0xff]   ;;  %v920_v4 = vld [vmem:[%s1317_s15] ss:$16 sps:$4 sm:$0xff]   ;;  %594 = vmatprep.mubr.bf16.mxu0 %v1121_v36 }
  0x5e   : > { %v921_v5 = vld [vmem:[%s1317_s15 + $0x8] ss:$16 sps:$4 sm:$0xff]   ;;  %v922_v6 = vld [vmem:[%s1317_s15 + $0x24] ss:$16 sps:$4 sm:$0xff]   ;;  %v924_v7 = vld [vmem:[%s1317_s15 + $0x2c] ss:$16 sps:$4 sm:$0xff]   ;;  %562 = vmatprep.subr.bf16.mxu0 %v916_v2  ;;  %605 = vmatprep.subr.bf16.mxu1 %v918_v3 }
  0x5f   : > { %563 = vmatpush1.bf16.msra.mxu0 %v920_v4  ;;  %606 = vmatpush1.bf16.msra.mxu1 %v921_v5  ;;  %v926_v16 = vld [vmem:[%s1317_s15 + $0x20] ss:$16 sps:$4 sm:$0xff]   ;;  %v927_v17 = vld [vmem:[%s1317_s15 + $0x28] ss:$16 sps:$4 sm:$0xff]   ;;  %v928_v18 = vld [vmem:[%s1317_s15 + $0x44] ss:$16 sps:$4 sm:$0xff]  }
  0x60   : > { %564 = vmatprep.subr.bf16.mxu0 %v922_v6  ;;  %607 = vmatprep.subr.bf16.mxu1 %v924_v7  ;;  %v930_v19 = vld [vmem:[%s1317_s15 + $0x4c] ss:$16 sps:$4 sm:$0xff]   ;;  %v932_v20 = vld [vmem:[%s1317_s15 + $0x40] ss:$16 sps:$4 sm:$0xff]   ;;  %v933_v21 = vld [vmem:[%s1317_s15 + $0x48] ss:$16 sps:$4 sm:$0xff]  }
  0x61   : > { %308 = vadd.xlane.f32.xlu0 %v305_v1  ;;  %v934_v22 = vld [vmem:[%s1317_s15 + $0x64] ss:$16 sps:$4 sm:$0xff]   ;;  %v936_v23 = vld [vmem:[%s1317_s15 + $0x6c] ss:$16 sps:$4 sm:$0xff]   ;;  %v938_v24 = vld [vmem:[%s1317_s15 + $0x60] ss:$16 sps:$4 sm:$0xff]   ;;  %637 = vmatprep.mubr.bf16.mxu1 %v1121_v36 }
  0x62   : > { %v939_v25 = vld [vmem:[%s1317_s15 + $0x68] ss:$16 sps:$4 sm:$0xff]   ;;  %v940_v26 = vld [vmem:[%s1317_s15 + $0x84] ss:$16 sps:$4 sm:$0xff]   ;;  %v942_v27 = vld [vmem:[%s1317_s15 + $0x8c] ss:$16 sps:$4 sm:$0xff]  }
  0x63   : > { %565 = vmatpush1.bf16.msra.mxu0 %v926_v16  ;;  %608 = vmatpush1.bf16.msra.mxu1 %v927_v17  ;;  %v944_v28 = vld [vmem:[%s1317_s15 + $0x80] ss:$16 sps:$4 sm:$0xff]   ;;  %v945_v29 = vld [vmem:[%s1317_s15 + $0x88] ss:$16 sps:$4 sm:$0xff]   ;;  %v946_v30 = vld [vmem:[%s1317_s15 + $0xa4] ss:$16 sps:$4 sm:$0xff]  }
  0x64   : > { %566 = vmatprep.subr.bf16.mxu0 %v928_v18  ;;  %609 = vmatprep.subr.bf16.mxu1 %v930_v19  ;;  %v948_v31 = vld [vmem:[%s1317_s15 + $0xac] ss:$16 sps:$4 sm:$0xff]   ;;  %v950_v32 = vld [vmem:[%s1317_s15 + $0xa0] ss:$16 sps:$4 sm:$0xff]   ;;  %v951_v33 = vld [vmem:[%s1317_s15 + $0xa8] ss:$16 sps:$4 sm:$0xff]  }
  0x65   : > { %v952_v34 = vld [vmem:[%s1317_s15 + $0xc4] ss:$16 sps:$4 sm:$0xff]   ;;  %v954_v35 = vld [vmem:[%s1317_s15 + $0xcc] ss:$16 sps:$4 sm:$0xff]   ;;  %v956_v37 = vld [vmem:[%s1317_s15 + $0xc0] ss:$16 sps:$4 sm:$0xff]  }
  0x66   : > { %v957_v38 = vld [vmem:[%s1317_s15 + $0xc8] ss:$16 sps:$4 sm:$0xff]   ;;  %v958_v39 = vld [vmem:[%s1317_s15 + $0xe4] ss:$16 sps:$4 sm:$0xff]   ;;  %v960_v40 = vld [vmem:[%s1317_s15 + $0xec] ss:$16 sps:$4 sm:$0xff]  }
  0x67   : > { %567 = vmatpush1.bf16.msra.mxu0 %v932_v20  ;;  %610 = vmatpush1.bf16.msra.mxu1 %v933_v21  ;;  %v962_v41 = vld [vmem:[%s1317_s15 + $0xe0] ss:$16 sps:$4 sm:$0xff]   ;;  %v963_v42 = vld [vmem:[%s1317_s15 + $0xe8] ss:$16 sps:$4 sm:$0xff]   ;;  %p297_p9 = scmp.lt.s32.totalorder %s792_s9, 7  ;;  %v383_v61 = vshrl.u32 %v382_v60, 7 }
  0x68   : > { %568 = vmatprep.subr.bf16.mxu0 %v934_v22  ;;  %611 = vmatprep.subr.bf16.mxu1 %v936_v23  ;;  %v793_v51 = vld [vmem:[%s1432_s1] ss:$0 sm:$0xff]  ;;  %s293_s13 = scalar_lea.vmem [#allocation7], %s791_s23  ;;  %s833_s24 = sshll.u32 %s1104_s21, 9 }
  0x69   : > { %v794_v55 = vld [vmem:[%s1433_s2] ss:$0 sm:$0xff]  ;;  %s1470_s9 = smov (!%p297_p9, %s792_s9), 7  ;;  %v384_v62 = vsub.s32 0, %v383_v61  ;;  %v392_v63 = vsub.s32 2, %v383_v61  ;;  %v396_v2 = vsub.s32 3, %v383_v61  ;;  %s1382_s14 = scalar_lea.hbm %s1436_s5, %s833_s24 }
  0x6a   : > { %s299_s8 = scalar_lea.vmem %s1435_s4, %s1470_s9  ;;  %s673_s17 = sshll.u32 %s293_s13, 4  ;;  %s1377_s17 = int_to_ptr.vmem [resolvable:$true] %s673_s17 }
  0x6b   : > { %569 = vmatpush1.bf16.msra.mxu0 %v938_v24  ;;  %612 = vmatpush1.bf16.msra.mxu1 %v939_v25  ;;  %s657_s15 = scalar_lea.sflag [#allocation4], %s1313_s16  ;;  %s1026_s26 = scalar_lea.vmem %s1377_s17, 1024 }
  0x6c   : > { %570 = vmatprep.subr.bf16.mxu0 %v940_v26  ;;  %613 = vmatprep.subr.bf16.mxu1 %v942_v27  ;;  %p1027_p11 = scmp.ne.s32.totalorder %s1377_s17, %s1026_s26  ;;  %p1458_p13 = scmp.ne.s32.totalorder %s1449_s29, 0 }
  0x6d   : > { %s1122_s28 = smov [#allocation7]  }
  0x6e   : > { %p1028_p4 = pnand %p1027_p11, %p1458_p13  ;;  %s1030_s6 = sshll.u32 %s1122_s28, 4  ;;  %s1031_s6 = int_to_ptr.vmem [resolvable:$false] %s1030_s6 }
  0x6f   : > { %571 = vmatpush1.bf16.msra.mxu0 %v944_v28  ;;  %614 = vmatpush1.bf16.msra.mxu1 %v945_v29  ;;  %s1032_s10 = scalar_lea.vmem %s1031_s6, 2048  ;;  %p1033_p10 = scmp.lt.s32.totalorder %s1377_s17, %s1031_s6 }
  0x70   : > { %572 = vmatprep.subr.bf16.mxu0 %v946_v30  ;;  %615 = vmatprep.subr.bf16.mxu1 %v948_v31  ;;  %p1029_p1 = pneg %p1028_p4  ;;  %p1034_p3 = scmp.lt.s32.totalorder %s1032_s10, %s1026_s26 }
  0x72   : > { %p1035_p6 = por %p1034_p3, %p1033_p10 }
  0x73   : > { %573 = vmatpush1.bf16.msra.mxu0 %v950_v32  ;;  %616 = vmatpush1.bf16.msra.mxu1 %v951_v33 }
  0x74   : > { %574 = vmatprep.subr.bf16.mxu0 %v952_v34  ;;  %617 = vmatprep.subr.bf16.mxu1 %v954_v35  ;;  %p1036_p0 = pnand %p1035_p6, %p1029_p1 }
  0x77   : > { %575 = vmatpush1.bf16.msra.mxu0 %v956_v37  ;;  %618 = vmatpush1.bf16.msra.mxu1 %v957_v38 }
  0x78   : > { %576 = vmatprep.subr.bf16.mxu0 %v958_v39  ;;  %619 = vmatprep.subr.bf16.mxu1 %v960_v40 }
  0x7b   : > { %577 = vmatpush1.bf16.msra.mxu0 %v962_v41  ;;  %620 = vmatpush1.bf16.msra.mxu1 %v963_v42 }
  0xea   : > { %v307_v8 = vpop.xlane.xlu0 %306 }
  0xeb   : > { %v311_v9 = vmul.f32 0.0078125, %v307_v8 }
  0xed   : > { %v1329_v10 = vsub.f32 %v304_v0, %v311_v9  ;;  %v380_v0 = vld [vmem:[%s299_s8] sm:$0xf] }
  0xee   : > { %v309_v11 = vpop.xlane.xlu0 %308  ;;  %v385_v3 = vrot.slane %v380_v0, %v384_v62  ;;  %v393_v4 = vrot.slane %v380_v0, %v392_v63  ;;  %v397_v6 = vrot.slane %v380_v0, %v396_v2 }
  0xef   : > { %v312_v12 = vmul.f32 0.0078125, %v309_v11  ;;  %v315_v13 = vmul.f32 %v1329_v10, %v1329_v10 }
  0xf1   : > { %v1333_v14 = vsub.f32 %v305_v1, %v312_v12  ;;  %317 = vadd.xlane.f32.xlu1 %v315_v13  ;;  %v388_v1 = vsub.s32 1, %v383_v61 }
  0xf3   : > { %v316_v15 = vmul.f32 %v1333_v14, %v1333_v14  ;;  %v389_v5 = vrot.slane %v380_v0, %v388_v1 }
  0xf5   : > { %319 = vadd.xlane.f32.xlu1 %v316_v15 }
 0x17e   : > { %v318_v43 = vpop.xlane.xlu1 %317 }
 0x17f   : > { %v321_v44 = vmul.f32 0.0078125, %v318_v43 }
 0x181   : > { %v323_v45 = vadd.f32 1e-05, %v321_v44 }
 0x182   : > { %v320_v46 = vpop.xlane.xlu1 %319 }
 0x183   : > { %964 = vrsqrt.f32 %v323_v45  ;;  %v322_v47 = vmul.f32 0.0078125, %v320_v46 }
 0x185   : > { %v324_v48 = vadd.f32 1e-05, %v322_v47 }
 0x187   : > { %966 = vrsqrt.f32 %v324_v48 }
 0x18d   : > { %v965_v49 = vpop.eup %964 }
 0x18e   : > { %v327_v50 = vmul.f32 %v965_v49, %v1329_v10 }
 0x190   : > { %v336_v54 = vmul.f32 %v793_v51, %v327_v50 }
 0x191   : > { %v967_v52 = vpop.eup %966 }
 0x192   : > { %v328_v53 = vmul.f32 %v967_v52, %v1333_v14  ;;  %v345_v57 = vadd.f32 %v794_v55, %v336_v54 }
 0x194   : > { %v337_v56 = vmul.f32 %v793_v51, %v328_v53 }
 0x196   : > { %v346_v58 = vadd.f32 %v794_v55, %v337_v56 }
 0x198   : > { %v347_v59 = vpack.c.bf16 %v346_v58, %v345_v57 }
 0x19a   : > { %595 = vmatmul.mubr.bf16.vlgmr.msra.gmra.mrb[0].mxu0 %v347_v59  ;;  %638 = vmatmul.mubr.bf16.vlgmr.msra.gmra.mrb[0].mxu1 %v347_v59 }
 0x26d   : > { %v596_v7 = vpop.f32.mrb[0].mxu0  ;;  %v639_v8 = vpop.f32.mrb[0].mxu1 }
 0x26e   : > { %v597_v9 = vadd.f32 %v596_v7, %v385_v3  ;;  %v640_v10 = vadd.f32 %v639_v8, %v393_v4  ;;  %v598_v11 = vpop.f32.mrb[1].mxu0  ;;  %v641_v12 = vpop.f32.mrb[1].mxu1 }
 0x26f   : > { %v599_v13 = vadd.f32 %v598_v11, %v389_v5  ;;  %v642_v14 = vadd.f32 %v641_v12, %v397_v6  ;;  %v600_v15 = vpop.f32.mrb[2].mxu0  ;;  %v643_v16 = vpop.f32.mrb[2].mxu1 }
 0x270   : > { %648 = vst [vmem:[%s293_s13] sm:$0xff] %v597_v9  ;;  %650 = vst [vmem:[%s293_s13 + $0x10] sm:$0xff] %v640_v10  ;;  %v601_v17 = vadd.f32 %v600_v15, %v385_v3  ;;  %v644_v18 = vadd.f32 %v643_v16, %v393_v4  ;;  %v602_v19 = vpop.f32.mrb[3].mxu0  ;;  %v645_v20 = vpop.f32.mrb[3].mxu1 }
 0x271   : > { %649 = vst [vmem:[%s293_s13 + $0x8] sm:$0xff] %v599_v13  ;;  %651 = vst [vmem:[%s293_s13 + $0x18] sm:$0xff] %v642_v14  ;;  %v603_v21 = vadd.f32 %v602_v19, %v389_v5  ;;  %v646_v22 = vadd.f32 %v645_v20, %v397_v6 }
 0x272   : > { %652 = vst [vmem:[%s293_s13 + $0x20] sm:$0xff] %v601_v17  ;;  %654 = vst [vmem:[%s293_s13 + $0x30] sm:$0xff] %v644_v18 }
 0x273   : > { %653 = vst [vmem:[%s293_s13 + $0x28] sm:$0xff] %v603_v21  ;;  %655 = vst [vmem:[%s293_s13 + $0x38] sm:$0xff] %v646_v22 }
 0x274   : > { %1039 = shalt.err (!%p1036_p0)
}
 0x275   : > { %s1040_s9 = scalar_lea.hbm %s1382_s14, 1024  ;;  %s1044_s8 = scalar_lea.hbm %s1436_s5, 2048 }
 0x276   : > { %p1041_p2 = scmp.ne.s32.totalorder %s1382_s14, %s1040_s9  ;;  %p1045_p5 = scmp.lt.u32.totalorder %s1382_s14, %s1436_s5 }
 0x277   : > { %p1046_p8 = scmp.lt.u32.totalorder %s1044_s8, %s1040_s9  ;;  %p1048_p11 = scmp.lt.u32.totalorder %s1040_s9, %s1382_s14 }
 0x278   : > { %p1042_p7 = pnand %p1041_p2, %p1458_p13 }
 0x279   : > { %p1047_p9 = por %p1046_p8, %p1045_p5 }
 0x27a   : > { %p1043_p12 = pneg %p1042_p7 }
 0x27b   : > { %p1049_p4 = por %p1048_p11, %p1047_p9 }
 0x27d   : > { %p1050_p1 = pnand %p1049_p4, %p1043_p12 }
 0x27f   : > { %1053 = shalt.err (!%p1050_p1)
}
 0x280   : > { %s1123_s24 = smov 512   ;;  %s1124_s21 = smov 1024  }
 0x281   : > { %s1125_s25 = smov 32  }
 0x282   : > { %840 = dma.vmem_to_hbm [thread:$0]  (%p1458_p13), %s1377_s17, 1024, %s1382_s14, %s657_s15, %s1123_s24, %s1124_s21, %s1125_s25  }
 0x283 PF: > { %s1459_s26 = sld [smem:[#allocation11_spill]]  ;;  %s688_s28 = sand.u32 1, %s1092_s18  }
 0x284   : > { %p1460_p10 = scmp.ne.s32.totalorder %s1450_s30, 0  ;;  %s689_s6 = scalar_lea.sflag [#allocation4], %s688_s28 }
 0x289   : > { %p1461_p3 = scmp.ge.s32.totalorder %s1459_s26, 2 }
 0x28b   : > { %p851_p6 = pnand %p1461_p3, %p1460_p10 }
 0x28d   : > { %1087 = dma.done.wait (!%p851_p6), %s689_s6, 1024  }
 0x28e   : > { %1089 = vsyncadd (!%p851_p6), %s689_s6, 4294966272  ;;  %s22_s23 = sadd.s32 1, %s1459_s26   ;;  %s1462_s18 = smov %s1096_s19 }
 0x28f   : > { %p19_p0 = scmp.ge.s32.totalorder %s22_s23, 4   ;;  %s1463_s19 = smov %s1100_s20 }
 0x290   : > { %s1464_s20 = smov %s1274_s7  ;;  %s1465_s21 = smov %s1108_s22 }
 0x291   : > { %s1466_s22 = smov %s1468_s11  ;;  %21 = sbr.rel (!%p19_p0) target bundleno = 7 (0x7), region = 94 }
 0x298   :  { %694 = vsyncpa [#allocation3], 1 }
 0x299   :  { %696 = vsyncpa [#allocation3 + $0x1], 1 }
 0x29a   :  { %697 = vsyncpa [#allocation6], 1 }
 0x29b   :  { %699 = vsyncpa [#allocation6 + $0x1], 1 }
 0x29c   :  { %700 = vsyncpa [#allocation4], 1 }
 0x29d   :  { %702 = vsyncpa [#allocation4 + $0x1], 1 }

</bundles_post_ra>
